<compile_context>
chip_gen: v7x
topology: tpu7x:2x2x1
jax: 0.10.0
libtpu: 0.0.40
codegen_flags: <defaults>
</compile_context>

<pallas_src>
import functools

import jax
import jax.numpy as jnp
from jax import lax
from jax.experimental import pallas as pl
from jax.experimental.pallas import tpu as pltpu

PACK = 8  # nodes packed per row (8 * F=32 -> 256 input lanes, 128 output lanes)


def _round_up(a, b):
    return pl.cdiv(a, b) * b


def _device_kind():
    try:
        return jax.devices()[0].device_kind.lower()
    except Exception:  # pragma: no cover - defensive
        return ""


# --------------------------------------------------------------------------- #
# Kernel
# --------------------------------------------------------------------------- #
def _node_mlp_kernel(x_ref, w1_ref, b1_ref, w2_ref, b2_ref, o_ref,
                     *, mxu_dtype, precision):
    # x_ref:  (TILE, PACK*F)      packed node features (lane-dense)
    # w1_ref: (PACK*F, PACK*H1)   block-diagonal W1 (mxu_dtype);  b1: (1, PACK*H1) f32
    # w2_ref: (PACK*H1, PACK*H2)  block-diagonal W2 (mxu_dtype);  b2: (1, PACK*H2) f32
    # o_ref:  (TILE, PACK*H2)     128-lane dense output (unmasked vst path)
    x = x_ref[...].astype(mxu_dtype)
    h = jnp.dot(x, w1_ref[...], preferred_element_type=jnp.float32,
                precision=precision)
    h = jnp.tanh(h + b1_ref[...])
    h = jnp.dot(h.astype(mxu_dtype), w2_ref[...],
                preferred_element_type=jnp.float32, precision=precision)
    h = jnp.tanh(h + b2_ref[...])
    o_ref[...] = h.astype(o_ref.dtype)


# --------------------------------------------------------------------------- #
# One-time parameter packing (hoisted out of the per-call path)
# --------------------------------------------------------------------------- #
def pack_node_mlp_params(w1, b1, w2, b2, *, mxu_dtype=jnp.bfloat16):
    """Build block-diagonal packed weights ONCE; reuse across forward calls.

    w1: (F, H1), w2: (H1, H2) in (in, out) layout (nn.Linear weight transposed).
    MXU operands are stored as `mxu_dtype` (bf16 default, f32 accumulation in
    the kernel); biases stay f32 (added to the f32 accumulator).
    """
    F, H1 = w1.shape
    H1b, H2 = w2.shape
    assert H1b == H1
    eye = jnp.eye(PACK, dtype=jnp.float32)
    w1_bd = jnp.kron(eye, w1.astype(jnp.float32)).astype(mxu_dtype)
    w2_bd = jnp.kron(eye, w2.astype(jnp.float32)).astype(mxu_dtype)
    b1_bd = jnp.tile(b1.astype(jnp.float32), PACK).reshape(1, PACK * H1)
    b2_bd = jnp.tile(b2.astype(jnp.float32), PACK).reshape(1, PACK * H2)
    return {"w1_bd": w1_bd, "b1_bd": b1_bd, "w2_bd": w2_bd, "b2_bd": b2_bd}


# --------------------------------------------------------------------------- #
# Forward
# --------------------------------------------------------------------------- #
def node_mlp_forward(x, params, *, max_tile_rows=None, out_dtype=None):
    """x: (N, F). params: output of pack_node_mlp_params. Returns (N, H2)."""
    N, F = x.shape
    w1_bd, b1_bd = params["w1_bd"], params["b1_bd"]
    w2_bd, b2_bd = params["w2_bd"], params["b2_bd"]
    assert w1_bd.shape[0] == PACK * F, "params were packed for a different F"
    H1 = w1_bd.shape[1] // PACK
    H2 = w2_bd.shape[1] // PACK

    mxu_dtype = w1_bd.dtype
    precision = (lax.Precision.HIGHEST if mxu_dtype == jnp.float32
                 else lax.Precision.DEFAULT)
    out_dtype = jnp.dtype(x.dtype if out_dtype is None else out_dtype)

    # ---- chip-aware tiling defaults -----------------------------------------
    kind = _device_kind()
    multi_tc = any(t in kind for t in ("v7", "v5p", "v4"))  # >1 TensorCore
    if max_tile_rows is None:
        # v7x: 3.2 TB/s -> a 2048-row tile is ~1us; use bigger tiles to
        # amortize the ~0.35us/step overhead. v5e/v6e: 2048 is already fine.
        max_tile_rows = 8192 if "v7" in kind else 2048

    # ---- choose packed-row tiling (tile count first, bounded padding) -------
    rows = pl.cdiv(N, PACK)                    # packed rows needed
    rows8 = max(_round_up(rows, 8), 8)         # sublane-aligned
    nt = pl.cdiv(rows8, max_tile_rows)         # number of grid steps
    if multi_tc and rows8 >= 16:
        # Give the "parallel" axis an even number of >=2 tiles so both
        # TensorCores get balanced work. Skipped on 1-TC chips (v5e/v6e).
        nt = _round_up(max(nt, 2), 2)
    tile_rows = _round_up(pl.cdiv(rows8, nt), 8)
    rows_pad = nt * tile_rows                  # padding bounded to <8 rows/tile
    n_pad = rows_pad * PACK

    # ---- pack input (pad only when the node count is ragged) ----------------
    if n_pad != N:
        # Extra HBM pass only in the ragged case; padded rows come out as
        # tanh(bias) and are dropped by the final slice.
        x = jnp.pad(x, ((0, n_pad - N), (0, 0)))
    xp = x.reshape(rows_pad, PACK * F)         # contiguous row-major -> free

    # ---- VMEM budget / cost hint ---------------------------------------------
    in_item = jnp.dtype(x.dtype).itemsize
    out_item = out_dtype.itemsize
    w_item = jnp.dtype(mxu_dtype).itemsize
    b_item = jnp.dtype(b1_bd.dtype).itemsize
    io_bytes = 2 * tile_rows * PACK * (F * in_item + H2 * out_item)   # dbl-buffered
    tmp_bytes = tile_rows * PACK * (F * w_item + H1 * (4 + w_item) + H2 * 4)
    w_bytes = (w1_bd.size + w2_bd.size) * w_item + (b1_bd.size + b2_bd.size) * b_item
    need = io_bytes + tmp_bytes + w_bytes
    vmem_limit_bytes = None
    if need > (24 << 20):                      # only raise above scoped default
        vmem_limit_bytes = int(min(need + (8 << 20), 60 << 20))

    cost = pl.CostEstimate(
        # FLOPs the kernel actually issues (block-diagonal shapes).
        flops=2 * rows_pad * (PACK * F * PACK * H1 + PACK * H1 * PACK * H2),
        transcendentals=rows_pad * PACK * (H1 + H2),
        bytes_accessed=(rows_pad * PACK * F * in_item
                        + rows_pad * PACK * H2 * out_item
                        + (w1_bd.size + w2_bd.size) * w_item
                        + (b1_bd.size + b2_bd.size) * b_item),
    )

    kernel = functools.partial(_node_mlp_kernel,
                               mxu_dtype=mxu_dtype, precision=precision)

    out_packed = pl.pallas_call(
        kernel,
        out_shape=jax.ShapeDtypeStruct((rows_pad, PACK * H2), out_dtype),
        grid_spec=pl.GridSpec(
            grid=(nt,),
            in_specs=[
                pl.BlockSpec((tile_rows, PACK * F), lambda i: (i, 0)),   # x tile
                pl.BlockSpec((PACK * F, PACK * H1), lambda i: (0, 0)),   # W1 (resident)
                pl.BlockSpec((1, PACK * H1), lambda i: (0, 0)),          # b1
                pl.BlockSpec((PACK * H1, PACK * H2), lambda i: (0, 0)),  # W2 (resident)
                pl.BlockSpec((1, PACK * H2), lambda i: (0, 0)),          # b2
            ],
            out_specs=pl.BlockSpec((tile_rows, PACK * H2), lambda i: (i, 0)),
        ),
        compiler_params=pltpu.CompilerParams(
            dimension_semantics=("parallel",),
            vmem_limit_bytes=vmem_limit_bytes,
        ),
        cost_estimate=cost,
    )(xp, w1_bd, b1_bd, w2_bd, b2_bd)

    out = out_packed.reshape(n_pad, H2)        # free reshape
    if n_pad != N:
        out = out[:N]                          # extra pass only in ragged case
    return out


def init_linear_params(key, in_features, out_features):
    """Deterministic PyTorch-style Linear init: U(-1/sqrt(in), 1/sqrt(in))."""
    kw, kb = jax.random.split(key)
    bound = 1.0 / (in_features ** 0.5)
    # PyTorch stores weight as (out, in); transpose to (in, out) for the kernel.
    w_torch = jax.random.uniform(
        kw, (out_features, in_features), jnp.float32, -bound, bound)
    b = jax.random.uniform(kb, (out_features,), jnp.float32, -bound, bound)
    return w_torch.T, b


if __name__ == "__main__":
    # Small shapes consistent with the module: N nodes x F=32 features,
    # layers=[16, 16].
    N, F = 64, 32
    H1, H2 = 16, 16

    root = jax.random.PRNGKey(0)
    k_x, k_l1, k_l2 = jax.random.split(root, 3)

    x = jax.random.normal(k_x, (N, F), jnp.float32)
    w1, b1 = init_linear_params(k_l1, F, H1)
    w2, b2 = init_linear_params(k_l2, H1, H2)

    # Plain-JAX references (same math as the PyTorch forward).
    ref_f32 = jnp.tanh(jnp.tanh(x @ w1 + b1) @ w2 + b2)

    def ref_bf16(xv):
        h = jnp.dot(xv.astype(jnp.bfloat16), w1.astype(jnp.bfloat16),
                    preferred_element_type=jnp.float32) + b1
        h = jnp.tanh(h)
        h = jnp.dot(h.astype(jnp.bfloat16), w2.astype(jnp.bfloat16),
                    preferred_element_type=jnp.float32) + b2
        return jnp.tanh(h)

    fwd = jax.jit(node_mlp_forward)

    # ---- default path: bf16 MXU operands, f32 accumulation -------------------
    params_bf16 = pack_node_mlp_params(w1, b1, w2, b2)           # packed ONCE
    out = jax.block_until_ready(fwd(x, params_bf16))
    assert out.shape == (N, H2)
    assert jnp.allclose(out, ref_bf16(x), atol=1e-3, rtol=0), \
        float(jnp.max(jnp.abs(out - ref_bf16(x))))
    assert jnp.allclose(out, ref_f32, atol=5e-2, rtol=0), \
        float(jnp.max(jnp.abs(out - ref_f32)))

    # ---- exact-f32 path (Precision.HIGHEST), tight check ---------------------
    params_f32 = pack_node_mlp_params(w1, b1, w2, b2, mxu_dtype=jnp.float32)
    out_f32 = jax.block_until_ready(fwd(x, params_f32))
    assert jnp.allclose(out_f32, ref_f32, atol=1e-5, rtol=1e-5)

    # ---- node count NOT a multiple of the pack/tile size (pad/slice path) ----
    N2 = 61
    x2 = jax.random.normal(jax.random.PRNGKey(1), (N2, F), jnp.float32)
    out2 = jax.block_until_ready(fwd(x2, params_f32))
    ref2 = jnp.tanh(jnp.tanh(x2 @ w1 + b1) @ w2 + b2)
    assert out2.shape == (N2, H2)
    assert jnp.allclose(out2, ref2, atol=1e-5, rtol=1e-5)

    print("KERNEL_OK")
</pallas_src>

<mosaic_0001>
module attributes {stable_mosaic.version = 11 : i64} {
  func.func @_node_mlp_kernel(%arg0: i32, %arg1: memref<8x256xf32, #tpu.memory_space<vmem>>, %arg2: memref<256x128xbf16, #tpu.memory_space<vmem>>, %arg3: memref<1x128xf32, #tpu.memory_space<vmem>>, %arg4: memref<128x128xbf16, #tpu.memory_space<vmem>>, %arg5: memref<1x128xf32, #tpu.memory_space<vmem>>, %arg6: memref<8x128xf32, #tpu.memory_space<vmem>>) attributes {dimension_semantics = [#tpu.dimension_semantics<parallel>], iteration_bounds = array<i64: 1>, scalar_prefetch = 0 : i64, scratch_operands = 0 : i64, tpu.core_type = #tpu.core_type<tc>, window_params = [{transform_indices = @transform_0, window_bounds = array<i64: 8, 256>}, {pipeline_mode = #tpu.pipeline_mode<synchronous>, transform_indices = @transform_1, window_bounds = array<i64: 256, 128>}, {pipeline_mode = #tpu.pipeline_mode<synchronous>, transform_indices = @transform_2, window_bounds = array<i64: 1, 128>}, {pipeline_mode = #tpu.pipeline_mode<synchronous>, transform_indices = @transform_3, window_bounds = array<i64: 128, 128>}, {pipeline_mode = #tpu.pipeline_mode<synchronous>, transform_indices = @transform_4, window_bounds = array<i64: 1, 128>}, {transform_indices = @transform_5, window_bounds = array<i64: 8, 128>}]} {
    %c0 = arith.constant 0 : index
    %c0_0 = arith.constant 0 : index
    %0 = vector.load %arg1[%c0, %c0_0] : memref<8x256xf32, #tpu.memory_space<vmem>>, vector<8x256xf32>
    %1 = arith.truncf %0 : vector<8x256xf32> to vector<8x256xbf16>
    %c0_1 = arith.constant 0 : index
    %c0_2 = arith.constant 0 : index
    %2 = vector.load %arg2[%c0_1, %c0_2] : memref<256x128xbf16, #tpu.memory_space<vmem>>, vector<256x128xbf16>
    %cst = arith.constant dense<0.000000e+00> : vector<8x128xf32>
    %3 = tpu.matmul %1, %2, %cst {dimension_numbers = #tpu.dot_dimension_numbers<[1], [0], [0], [1], [0, 0, 1, 1], [], []>} : vector<8x256xbf16>, vector<256x128xbf16>, vector<8x128xf32> -> vector<8x128xf32>
    %c0_3 = arith.constant 0 : index
    %c0_4 = arith.constant 0 : index
    %4 = vector.load %arg3[%c0_3, %c0_4] : memref<1x128xf32, #tpu.memory_space<vmem>>, vector<1x128xf32>
    %5 = vector.broadcast %4 : vector<1x128xf32> to vector<8x128xf32>
    %6 = arith.addf %3, %5 : vector<8x128xf32>
    %7 = math.tanh %6 : vector<8x128xf32>
    %8 = arith.truncf %7 : vector<8x128xf32> to vector<8x128xbf16>
    %c0_5 = arith.constant 0 : index
    %c0_6 = arith.constant 0 : index
    %9 = vector.load %arg4[%c0_5, %c0_6] : memref<128x128xbf16, #tpu.memory_space<vmem>>, vector<128x128xbf16>
    %cst_7 = arith.constant dense<0.000000e+00> : vector<8x128xf32>
    %10 = tpu.matmul %8, %9, %cst_7 {dimension_numbers = #tpu.dot_dimension_numbers<[1], [0], [0], [1], [0, 0, 1, 1], [], []>} : vector<8x128xbf16>, vector<128x128xbf16>, vector<8x128xf32> -> vector<8x128xf32>
    %c0_8 = arith.constant 0 : index
    %c0_9 = arith.constant 0 : index
    %11 = vector.load %arg5[%c0_8, %c0_9] : memref<1x128xf32, #tpu.memory_space<vmem>>, vector<1x128xf32>
    %12 = vector.broadcast %11 : vector<1x128xf32> to vector<8x128xf32>
    %13 = arith.addf %10, %12 : vector<8x128xf32>
    %14 = math.tanh %13 : vector<8x128xf32>
    %c0_10 = arith.constant 0 : index
    %c0_11 = arith.constant 0 : index
    %15 = vector.load %arg6[%c0_10, %c0_11] : memref<8x128xf32, #tpu.memory_space<vmem>>, vector<8x128xf32>
    tpu.vector_store %arg6[%c0_10, %c0_11], %14 {strides = array<i32>} : memref<8x128xf32, #tpu.memory_space<vmem>>, vector<8x128xf32>,
    return
  }
  func.func @transform_0(%arg0: i32) -> (i32, i32) {
    %c0_i32 = arith.constant 0 : i32
    %c0_i32_0 = arith.constant 0 : i32
    return %arg0, %c0_i32 : i32, i32
  }
  func.func @transform_1(%arg0: i32) -> (i32, i32) {
    %c0_i32 = arith.constant 0 : i32
    %c0_i32_0 = arith.constant 0 : i32
    %c0_i32_1 = arith.constant 0 : i32
    return %c0_i32, %c0_i32_0 : i32, i32
  }
  func.func @transform_2(%arg0: i32) -> (i32, i32) {
    %c0_i32 = arith.constant 0 : i32
    %c0_i32_0 = arith.constant 0 : i32
    %c0_i32_1 = arith.constant 0 : i32
    return %c0_i32, %c0_i32_0 : i32, i32
  }
  func.func @transform_3(%arg0: i32) -> (i32, i32) {
    %c0_i32 = arith.constant 0 : i32
    %c0_i32_0 = arith.constant 0 : i32
    %c0_i32_1 = arith.constant 0 : i32
    return %c0_i32, %c0_i32_0 : i32, i32
  }
  func.func @transform_4(%arg0: i32) -> (i32, i32) {
    %c0_i32 = arith.constant 0 : i32
    %c0_i32_0 = arith.constant 0 : i32
    %c0_i32_1 = arith.constant 0 : i32
    return %c0_i32, %c0_i32_0 : i32, i32
  }
  func.func @transform_5(%arg0: i32) -> (i32, i32) {
    %c0_i32 = arith.constant 0 : i32
    %c0_i32_0 = arith.constant 0 : i32
    return %arg0, %c0_i32 : i32, i32
  }
}

</mosaic_0001>

<bundles_post_ra>
// kernel: node_mlp_forward.1
= control target key start
LH: loop header
LB: loop body
LE: loop exit
PB: predicated region body
PF: predicated region fallthrough
CT: control target
= control target key end

     0   :  { %10 = vsyncpa [#allocation3], 0  ;;  %s468_s18 = smov [#allocation2]   ;;  %s578_s0 = inlined_call_operand.vmem [shape: f32[8,256], index: 0, kind: input, shape index: {}]   ;;  %s579_s1 = inlined_call_operand.vmem [shape: bf16[256,128], index: 1, kind: input, shape index: {}]   ;;  %s580_s2 = inlined_call_operand.vmem [shape: f32[1,128], index: 2, kind: input, shape index: {}]   ;;  %s581_s3 = inlined_call_operand.hbm [shape: bf16[128,128], index: 3, kind: input, shape index: {}]   ;;  %s582_s4 = inlined_call_operand.vmem [shape: f32[1,128], index: 4, kind: input, shape index: {}]   ;;  %s583_s5 = inlined_call_operand.vmem [shape: f32[8,128], index: 5, kind: output, shape index: {}]  }
   0x1   :  { %s22_s19 = sshll.u32 %s468_s18, 4  ;;  %s444_s22 = scalar_lea.hbm %s581_s3, 1024  ;;  %s23_s19 = int_to_ptr.vmem [resolvable:$true] %s22_s19 }
   0x2   :  { %p445_p0 = scmp.ne.s32.totalorder %s581_s3, %s444_s22  ;;  %p448_p1 = scmp.lt.u32.totalorder %s444_s22, %s581_s3 }
   0x4   :  { %p450_p2 = pnand %p448_p1, %p445_p0 }
   0x6   :  { %453 = shalt.err (!%p450_p2)
}
   0x7   :  { %s454_s27 = scalar_lea.vmem %s23_s19, 1024  ;;  %p459_p4 = scmp.lt.s32.totalorder %s23_s19, %s23_s19 }
   0x8   :  { %p455_p3 = scmp.ne.s32.totalorder %s23_s19, %s454_s27  ;;  %p460_p5 = scmp.lt.s32.totalorder %s454_s27, %s454_s27 }
   0xa   :  { %p461_p6 = por %p460_p5, %p459_p4 }
   0xc   :  { %p462_p7 = pnand %p461_p6, %p455_p3 }
   0xe   :  { %465 = shalt.err (!%p462_p7)
}
   0xf   :  { %s469_s28 = smov 64   ;;  %s470_s29 = smov 4  }
  0x10   :  { %28 = dma.hbm_to_vmem [thread:$0]  %s581_s3, 1024, %s23_s19, [#allocation3], %s469_s28, %s469_s28, %s470_s29  }
  0x11   :  { %466 = dma.done.wait [#allocation3], 1024  }
  0x12   :  { %467 = vsyncadd [#allocation3], 4294966272  ;;  %v471_v0 = vmov 0.0   ;;  %v416_v1 = vld [vmem:[%s579_s1 + $0x40] sm:$0xff]   ;;  %v418_v3 = vld [vmem:[%s579_s1 + $0x48] sm:$0xff]   ;;  %vm472_vm0 = vmmov 0  }
  0x13   :  { %391 = vmatprep.subr.bf16.mxu1 %v471_v0  ;;  %v417_v2 = vld [vmem:[%s579_s1] sm:$0xff]   ;;  %360 = vmatprep.subr.bf16.mxu0 %v416_v1  ;;  %v419_v4 = vld [vmem:[%s579_s1 + $0x8] sm:$0xff]   ;;  %v420_v5 = vld [vmem:[%s579_s1 + $0x50] sm:$0xff]  }
  0x14   :  { %361 = vmatpush3.bf16.msra.mxu0 %v417_v2  ;;  %v421_v6 = vld [vmem:[%s579_s1 + $0x10] sm:$0xff]   ;;  %v422_v7 = vld [vmem:[%s579_s1 + $0x58] sm:$0xff]   ;;  %v424_v9 = vld [vmem:[%s579_s1 + $0x60] sm:$0xff]   ;;  %407 = vmatprep.mubr.msk.bf16.mxu1 %vm472_vm0, %v471_v0 }
  0x15   :  { %362 = vmatprep.subr.bf16.mxu0 %v418_v3  ;;  %v423_v8 = vld [vmem:[%s579_s1 + $0x18] sm:$0xff]   ;;  %v425_v10 = vld [vmem:[%s579_s1 + $0x20] sm:$0xff]   ;;  %v426_v11 = vld [vmem:[%s579_s1 + $0x68] sm:$0xff]  }
  0x16   :  { %v36_v12 = vld [vmem:[%s578_s0 + $0x8] sm:$0xff]  ;;  %v432_v15 = vld [vmem:[#allocation2] sm:$0xff]   ;;  %v428_v16 = vld [vmem:[%s579_s1 + $0x70] sm:$0xff]  }
  0x17   :  { %v427_v13 = vld [vmem:[%s579_s1 + $0x28] sm:$0xff]   ;;  %v38_v14 = vpack.c.bf16 %v36_v12, %v36_v12  ;;  %392 = vmatpush3.bf16.msra.mxu1 %v432_v15  ;;  %v429_v18 = vld [vmem:[%s579_s1 + $0x30] sm:$0xff]   ;;  %v430_v19 = vld [vmem:[%s579_s1 + $0x78] sm:$0xff]  }
  0x18   :  { %363 = vmatpush3.bf16.msra.mxu0 %v419_v4  ;;  %v433_v17 = vld [vmem:[#allocation2 + $0x8] sm:$0xff]   ;;  %393 = vmatprep.subr.bf16.mxu1 %v471_v0  ;;  %v434_v20 = vld [vmem:[#allocation2 + $0x10] sm:$0xff]   ;;  %v431_v21 = vld [vmem:[%s579_s1 + $0x38] sm:$0xff]  }
  0x19   :  { %364 = vmatprep.subr.bf16.mxu0 %v420_v5  ;;  %206 = vmatprep.mubr.bf16.mxu0 %v38_v14  ;;  %v35_v22 = vld [vmem:[%s578_s0] sm:$0xff]  ;;  %v435_v24 = vld [vmem:[#allocation2 + $0x18] sm:$0xff]   ;;  %v437_v26 = vld [vmem:[#allocation2 + $0x28] sm:$0xff]  }
  0x1a   :  { %v37_v23 = vpack.c.bf16 %v35_v22, %v35_v22  ;;  %v436_v25 = vld [vmem:[#allocation2 + $0x20] sm:$0xff]   ;;  %v438_v27 = vld [vmem:[#allocation2 + $0x30] sm:$0xff]   ;;  %v439_v28 = vld [vmem:[#allocation2 + $0x38] sm:$0xff]  }
  0x1b   :  { %394 = vmatpush3.bf16.msra.mxu1 %v433_v17  ;;  %v334_v30 = vld [vmem:[%s580_s2] ss:$0 sm:$0xff] }
  0x1c   :  { %365 = vmatpush3.bf16.msra.mxu0 %v421_v6  ;;  %395 = vmatprep.subr.bf16.mxu1 %v471_v0  ;;  %v351_v38 = vld [vmem:[%s582_s4] ss:$0 sm:$0xff] }
  0x1d   :  { %366 = vmatprep.subr.bf16.mxu0 %v422_v7 }
  0x1f   :  { %396 = vmatpush3.bf16.msra.mxu1 %v434_v20 }
  0x20   :  { %367 = vmatpush3.bf16.msra.mxu0 %v423_v8  ;;  %397 = vmatprep.subr.bf16.mxu1 %v471_v0 }
  0x21   :  { %368 = vmatprep.subr.bf16.mxu0 %v424_v9 }
  0x23   :  { %398 = vmatpush3.bf16.msra.mxu1 %v435_v24 }
  0x24   :  { %369 = vmatpush3.bf16.msra.mxu0 %v425_v10  ;;  %399 = vmatprep.subr.bf16.mxu1 %v471_v0 }
  0x25   :  { %370 = vmatprep.subr.bf16.mxu0 %v426_v11 }
  0x27   :  { %400 = vmatpush3.bf16.msra.mxu1 %v436_v25 }
  0x28   :  { %371 = vmatpush3.bf16.msra.mxu0 %v427_v13  ;;  %401 = vmatprep.subr.bf16.mxu1 %v471_v0 }
  0x29   :  { %372 = vmatprep.subr.bf16.mxu0 %v428_v16 }
  0x2b   :  { %402 = vmatpush3.bf16.msra.mxu1 %v437_v26 }
  0x2c   :  { %373 = vmatpush3.bf16.msra.mxu0 %v429_v18  ;;  %403 = vmatprep.subr.bf16.mxu1 %v471_v0 }
  0x2d   :  { %374 = vmatprep.subr.bf16.mxu0 %v430_v19 }
  0x2f   :  { %404 = vmatpush3.bf16.msra.mxu1 %v438_v27 }
  0x30   :  { %375 = vmatpush3.bf16.msra.mxu0 %v431_v21  ;;  %405 = vmatprep.subr.bf16.mxu1 %v471_v0 }
  0x33   :  { %207 = vmatmul.mubr.bf16.vlgmr.msra.gmra.mrb[0].mxu0 %v37_v23  ;;  %406 = vmatpush3.bf16.msra.mxu1 %v439_v28 }
 0x106   :  { %v376_v29 = vpop.f32.mrb[0].mxu0 }
 0x107   :  { %v377_v31 = vpop.f32.mrb[1].mxu0 }
 0x108   :  { %v378_v32 = vadd.f32 %v377_v31, %v376_v29  ;;  %v379_v33 = vpop.f32.mrb[2].mxu0 }
 0x109   :  { %v380_v34 = vpop.f32.mrb[3].mxu0 }
 0x10a   :  { %v209_v35 = vadd.f32 %v378_v32, %v334_v30 }
 0x10c   :  { %440 = vtanh.f32 %v209_v35 }
 0x116   :  { %v441_v36 = vpop.eup %440 }
 0x117   :  { %v215_v37 = vpack.c.bf16 %v441_v36, %v441_v36 }
 0x119   :  { %408 = vmatmul.mubr.bf16.vlgmr.msra.gmra.mrb[0].mxu1 %v215_v37 }
 0x1ec   :  { %v321_v39 = vpop.f32.mrb[0].mxu1 }
 0x1ed   :  { %v322_v40 = vadd.f32 %v351_v38, %v321_v39  ;;  %v409_v41 = vpop.f32.mrb[1].mxu1 }
 0x1ee   :  { %v324_v42 = vpop.f32.mrb[2].mxu1 }
 0x1ef   :  { %442 = vtanh.f32 %v322_v40  ;;  %v410_v43 = vpop.f32.mrb[3].mxu1 }
 0x1f9   :  { %v443_v44 = vpop.eup %442 }
 0x1fa   :  { %328 = vst [vmem:[%s583_s5] sm:$0xff] %v443_v44 }
 0x1fb   :  { %333 = vsyncpa [#allocation3], 1 }

</bundles_post_ra>
